<compile_context>
chip_gen: v6e
topology: v6e:2x2x1
jax: 0.10.0
libtpu: 0.0.40
codegen_flags: <defaults>
</compile_context>

<pallas_src>
import jax
import jax.numpy as jnp
from jax.experimental import pallas as pl
from jax.experimental.pallas import tpu as pltpu


# ---------------------------------------------------------------------------
# Kernels
# ---------------------------------------------------------------------------
def _vpu_mix_kernel(w_ref, z_ref, o_ref):
    """out[:, i, :] = sum_j W[i, j] * z[:, j, :], densely on the VPU.

    w_ref: (C, C) f32 in VMEM (weight-stationary: constant index_map).
    z_ref, o_ref: (b_blk, C, t_tile) blocks in VMEM.
    """
    b_blk, c, tt = z_ref.shape
    w = w_ref[...]                                       # (C, C) f32, one tiny tile
    acc = None
    for j in range(c):
        # Input channel j broadcast across the channel (sublane) axis so the
        # multiplies/adds below run on fully packed vregs even for batch == 1.
        zj = jnp.broadcast_to(
            z_ref[:, j:j + 1, :].astype(jnp.float32), (b_blk, c, tt))
        term = w[None, :, j:j + 1] * zj                  # column W[:, j] scales
        acc = term if acc is None else acc + term
    o_ref[...] = acc.astype(o_ref.dtype)                 # ONE dense full-block store


def _mxu_mix_kernel(w_ref, z_ref, o_ref):
    """Fallback for larger C: one weight-stationary (C,C) @ (C,t_tile) matmul
    per grid step (b_blk forced to 1, so no per-batch Python loop of dots)."""
    o_ref[0] = jnp.dot(
        w_ref[...], z_ref[0], preferred_element_type=jnp.float32
    ).astype(o_ref.dtype)


# ---------------------------------------------------------------------------
# Tiling helpers
# ---------------------------------------------------------------------------
def _round_down(x, m):
    return (x // m) * m


def _round_up(x, m):
    return ((x + m - 1) // m) * m


def _largest_divisor_le(n, cap):
    cap = max(1, min(n, cap))
    for d in range(cap, 0, -1):
        if n % d == 0:
            return d
    return 1


def _vmem_capacity_bytes():
    try:
        return int(pltpu.get_tpu_info().vmem_capacity_bytes)
    except Exception:
        return 64 * 1024 * 1024  # conservative (v7x-sized) default


def _choose_tiles(batch, c, t, itemsize, target_bytes, force_b1):
    # Lane (T) tile: full T when small, else a lane-dense multiple of 128.
    # The grid uses cdiv, so a ragged trailing T block is masked, never padded.
    if t <= 256:
        t_tile = t
    else:
        budget_t = max(128, _round_down(target_bytes // (c * itemsize), 128))
        t_tile = min(_round_down(t, 128), budget_t)

    # Batch rows per block: fill the remaining byte budget (divisor of batch
    # keeps every block full).  The MXU path keeps b_blk = 1 (one wide matmul
    # per step) and grows the T tile instead.
    if force_b1:
        b_blk = 1
    else:
        cap = max(1, target_bytes // (c * t_tile * itemsize))
        b_blk = _largest_divisor_le(batch, cap)

    grid_b = batch // b_blk
    grid_t = pl.cdiv(t, t_tile)
    # Guarantee >= 2 grid steps along the "parallel" axes whenever possible so
    # dual-TensorCore chips (v7x) both get work.
    if grid_b * grid_t < 2:
        if b_blk > 1:
            b_blk = _largest_divisor_le(batch, b_blk // 2)
        elif t > 256:
            t_tile = _round_up(pl.cdiv(t, 2), 128)
    return b_blk, t_tile


# ---------------------------------------------------------------------------
# Wrapper
# ---------------------------------------------------------------------------
def _apply_channel_mix(z, w32):
    """out[n, :, t] = w32 @ z[n, :, t] via a Pallas TPU kernel."""
    batch, c, t = z.shape
    itemsize = jnp.dtype(z.dtype).itemsize

    vmem_cap = _vmem_capacity_bytes()
    # ~6.4 MiB blocks on 128 MiB-VMEM chips (v5e/v6e), ~3.2 MiB on v7x; leaves
    # room for double-buffered in/out blocks plus f32 accumulation temps.
    target_bytes = max(1 << 20, vmem_cap // 20)

    # VPU broadcast-mix wins for tiny C; crossover to the MXU around C > 8
    # (conservative for v7x, where the 4-slot VALU saturates first beyond that).
    use_mxu = c > 8
    b_blk, t_tile = _choose_tiles(batch, c, t, itemsize, target_bytes,
                                  force_b1=use_mxu)

    grid = (batch // b_blk, pl.cdiv(t, t_tile))
    z_spec = pl.BlockSpec((b_blk, c, t_tile), lambda b, tb: (b, 0, tb))
    # Weight-stationary: constant block index, so Pallas does not re-fetch W
    # across grid steps.
    w_spec = pl.BlockSpec((c, c), lambda b, tb: (0, 0))
    kernel = _mxu_mix_kernel if use_mxu else _vpu_mix_kernel

    block_bytes = b_blk * c * t_tile * itemsize
    vmem_limit = int(min(vmem_cap * 3 // 4,
                         max(16 * 1024 * 1024, 8 * block_bytes)))

    cost = pl.CostEstimate(
        flops=2 * batch * c * c * t,
        transcendentals=0,
        bytes_accessed=2 * batch * c * t * itemsize + c * c * 4,
    )

    return pl.pallas_call(
        kernel,
        out_shape=jax.ShapeDtypeStruct((batch, c, t), z.dtype),
        grid_spec=pltpu.PrefetchScalarGridSpec(
            num_scalar_prefetch=0,
            grid=grid,
            in_specs=[w_spec, z_spec],
            out_specs=z_spec,
        ),
        compiler_params=pltpu.CompilerParams(
            dimension_semantics=("parallel", "parallel"),
            vmem_limit_bytes=vmem_limit,
        ),
        cost_estimate=cost,
    )(w32, z)


def invertible_1x1_conv_forward(z, W):
    """Forward pass of Invertible1x1Conv (reverse=False).

    Args:
      z: (batch, C, T) float array.
      W: (C, C) or (C, C, 1) weight (the squeezed / raw conv weight).

    Returns:
      (z_out, log_det_W) matching the PyTorch module's forward.
    """
    if W.ndim == 3:                      # accept the (C, C, 1) conv-weight layout
        W = W[..., 0]
    batch, _, t = z.shape
    w32 = W.astype(jnp.float32)

    z_out = _apply_channel_mix(z, w32)

    # TODO(synk): logdet (LU decomposition) has no clean Pallas equivalent; it
    # is a tiny CxC op and stays in plain JAX.  Matches torch.logdet semantics:
    # -inf for det == 0, NaN for det < 0.
    sign, logabsdet = jnp.linalg.slogdet(w32)
    log_det = jnp.where(sign > 0, logabsdet,
                        jnp.where(sign == 0, -jnp.inf, jnp.nan))
    log_det_W = (batch * t) * log_det
    return z_out, log_det_W


def invertible_1x1_conv_reverse(z, W):
    """Reverse branch (reverse=True): z <- W^{-1} @ z, same kernel."""
    if W.ndim == 3:
        W = W[..., 0]
    w_inv = jnp.linalg.inv(W.astype(jnp.float32))   # tiny CxC op, plain JAX
    return _apply_channel_mix(z, w_inv)


def make_weight(c, key):
    """Matches the PyTorch __init__: QR of a normal matrix, first column
    flipped if det < 0 (so det == +1)."""
    normal = jax.random.normal(key, (c, c), dtype=jnp.float32)
    W, _ = jnp.linalg.qr(normal)
    detW = jnp.linalg.det(W)
    W = W.at[:, 0].set(jnp.where(detW < 0, -W[:, 0], W[:, 0]))
    return W


if __name__ == "__main__":
    key = jax.random.PRNGKey(0)

    def check(batch, c, t, k):
        kw, kz = jax.random.split(k)
        W = make_weight(c, kw)
        z = jax.random.normal(kz, (batch, c, t), dtype=jnp.float32)

        z_out, log_det_W = invertible_1x1_conv_forward(z, W)
        jax.block_until_ready((z_out, log_det_W))

        ref = jnp.einsum("ij,bjt->bit", W, z)
        _, logabsdet = jnp.linalg.slogdet(W)
        assert z_out.shape == (batch, c, t)
        assert jnp.allclose(z_out, ref, atol=1e-4, rtol=1e-4), (batch, c, t)
        assert jnp.allclose(log_det_W, batch * t * logabsdet, atol=1e-3), (batch, c, t)

        z_back = invertible_1x1_conv_reverse(z_out, W)
        jax.block_until_ready(z_back)
        assert jnp.allclose(z_back, z, atol=1e-3), (batch, c, t)

    k0, k1, k2 = jax.random.split(key, 3)
    check(2, 4, 256, k0)    # VPU path, lane-aligned T, batch split across grid
    check(2, 4, 300, k1)    # VPU path, ragged trailing T block (cdiv + masking)
    check(1, 16, 384, k2)   # MXU path (C > 8), two T blocks, ragged tail

    print("KERNEL_OK")
</pallas_src>

<mosaic_0001>
module attributes {stable_mosaic.version = 11 : i64} {
  func.func @_vpu_mix_kernel(%arg0: i32, %arg1: i32, %arg2: memref<4x4xf32, #tpu.memory_space<vmem>>, %arg3: memref<1x4x256xf32, #tpu.memory_space<vmem>>, %arg4: memref<1x4x256xf32, #tpu.memory_space<vmem>>) attributes {dimension_semantics = [#tpu.dimension_semantics<parallel>, #tpu.dimension_semantics<parallel>], iteration_bounds = array<i64: 2, 1>, scalar_prefetch = 0 : i64, scratch_operands = 0 : i64, tpu.core_type = #tpu.core_type<tc>, window_params = [{pipeline_mode = #tpu.pipeline_mode<synchronous>, transform_indices = @transform_0, window_bounds = array<i64: 4, 4>}, {transform_indices = @transform_1, window_bounds = array<i64: 1, 4, 256>}, {transform_indices = @transform_2, window_bounds = array<i64: 1, 4, 256>}]} {
    %c0 = arith.constant 0 : index
    %c0_0 = arith.constant 0 : index
    %0 = vector.load %arg2[%c0, %c0_0] : memref<4x4xf32, #tpu.memory_space<vmem>>, vector<4x4xf32>
    %c0_1 = arith.constant 0 : index
    %c0_2 = arith.constant 0 : index
    %c0_3 = arith.constant 0 : index
    %1 = vector.load %arg3[%c0_1, %c0_2, %c0_3] : memref<1x4x256xf32, #tpu.memory_space<vmem>>, vector<1x1x256xf32>
    %2 = vector.shape_cast %1 : vector<1x1x256xf32> to vector<1x1x256xf32>
    %3 = vector.broadcast %2 : vector<1x1x256xf32> to vector<1x4x256xf32>
    %4 = vector.extract_strided_slice %0 {offsets = [0, 0], sizes = [4, 1], strides = [1, 1]} : vector<4x4xf32> to vector<4x1xf32>
    %5 = vector.shape_cast %4 : vector<4x1xf32> to vector<1x4x1xf32>
    %6 = vector.broadcast %5 : vector<1x4x1xf32> to vector<1x4x256xf32>
    %7 = arith.mulf %6, %3 : vector<1x4x256xf32>
    %c0_4 = arith.constant 0 : index
    %c1 = arith.constant 1 : index
    %c0_5 = arith.constant 0 : index
    %8 = vector.load %arg3[%c0_4, %c1, %c0_5] : memref<1x4x256xf32, #tpu.memory_space<vmem>>, vector<1x1x256xf32>
    %9 = vector.shape_cast %8 : vector<1x1x256xf32> to vector<1x1x256xf32>
    %10 = vector.broadcast %9 : vector<1x1x256xf32> to vector<1x4x256xf32>
    %11 = vector.extract_strided_slice %0 {offsets = [0, 1], sizes = [4, 1], strides = [1, 1]} : vector<4x4xf32> to vector<4x1xf32>
    %12 = vector.shape_cast %11 : vector<4x1xf32> to vector<1x4x1xf32>
    %13 = vector.broadcast %12 : vector<1x4x1xf32> to vector<1x4x256xf32>
    %14 = arith.mulf %13, %10 : vector<1x4x256xf32>
    %15 = arith.addf %7, %14 : vector<1x4x256xf32>
    %c0_6 = arith.constant 0 : index
    %c2 = arith.constant 2 : index
    %c0_7 = arith.constant 0 : index
    %16 = vector.load %arg3[%c0_6, %c2, %c0_7] : memref<1x4x256xf32, #tpu.memory_space<vmem>>, vector<1x1x256xf32>
    %17 = vector.shape_cast %16 : vector<1x1x256xf32> to vector<1x1x256xf32>
    %18 = vector.broadcast %17 : vector<1x1x256xf32> to vector<1x4x256xf32>
    %19 = vector.extract_strided_slice %0 {offsets = [0, 2], sizes = [4, 1], strides = [1, 1]} : vector<4x4xf32> to vector<4x1xf32>
    %20 = vector.shape_cast %19 : vector<4x1xf32> to vector<1x4x1xf32>
    %21 = vector.broadcast %20 : vector<1x4x1xf32> to vector<1x4x256xf32>
    %22 = arith.mulf %21, %18 : vector<1x4x256xf32>
    %23 = arith.addf %15, %22 : vector<1x4x256xf32>
    %c0_8 = arith.constant 0 : index
    %c3 = arith.constant 3 : index
    %c0_9 = arith.constant 0 : index
    %24 = vector.load %arg3[%c0_8, %c3, %c0_9] : memref<1x4x256xf32, #tpu.memory_space<vmem>>, vector<1x1x256xf32>
    %25 = vector.shape_cast %24 : vector<1x1x256xf32> to vector<1x1x256xf32>
    %26 = vector.broadcast %25 : vector<1x1x256xf32> to vector<1x4x256xf32>
    %27 = vector.extract_strided_slice %0 {offsets = [0, 3], sizes = [4, 1], strides = [1, 1]} : vector<4x4xf32> to vector<4x1xf32>
    %28 = vector.shape_cast %27 : vector<4x1xf32> to vector<1x4x1xf32>
    %29 = vector.broadcast %28 : vector<1x4x1xf32> to vector<1x4x256xf32>
    %30 = arith.mulf %29, %26 : vector<1x4x256xf32>
    %31 = arith.addf %23, %30 : vector<1x4x256xf32>
    %c0_10 = arith.constant 0 : index
    %c0_11 = arith.constant 0 : index
    %c0_12 = arith.constant 0 : index
    %32 = vector.load %arg4[%c0_10, %c0_11, %c0_12] : memref<1x4x256xf32, #tpu.memory_space<vmem>>, vector<1x4x256xf32>
    tpu.vector_store %arg4[%c0_10, %c0_11, %c0_12], %31 {strides = array<i32>} : memref<1x4x256xf32, #tpu.memory_space<vmem>>, vector<1x4x256xf32>,
    return
  }
  func.func @transform_0(%arg0: i32, %arg1: i32) -> (i32, i32) {
    %c0_i32 = arith.constant 0 : i32
    %c0_i32_0 = arith.constant 0 : i32
    %c0_i32_1 = arith.constant 0 : i32
    return %c0_i32, %c0_i32_0 : i32, i32
  }
  func.func @transform_1(%arg0: i32, %arg1: i32) -> (i32, i32, i32) {
    %c0_i32 = arith.constant 0 : i32
    %c0_i32_0 = arith.constant 0 : i32
    return %arg0, %c0_i32, %arg1 : i32, i32, i32
  }
  func.func @transform_2(%arg0: i32, %arg1: i32) -> (i32, i32, i32) {
    %c0_i32 = arith.constant 0 : i32
    %c0_i32_0 = arith.constant 0 : i32
    return %arg0, %c0_i32, %arg1 : i32, i32, i32
  }
}

</mosaic_0001>

<bundles_post_ra>
// kernel: tpu_custom_call.1
= control target key start
LH: loop header
LB: loop body
LE: loop exit
PB: predicated region body
PF: predicated region fallthrough
CT: control target
= control target key end

     0   :  { %7 = vsyncpa [#allocation3], 0  ;;  %s825_s0 = inlined_call_operand.hbm [shape: f32[4,4], index: 0, kind: input, shape index: {}]   ;;  %s826_s1 = inlined_call_operand.hbm [shape: f32[2,4,256], index: 1, kind: input, shape index: {}]   ;;  %s827_s2 = inlined_call_operand.hbm [shape: f32[2,4,256], index: 2, kind: output, shape index: {}]  }
   0x1   :  { %8 = vsyncpa [#allocation6], 0 }
   0x2   :  { %10 = vsyncpa [#allocation6 + $0x1], 0 }
   0x3   :  { %11 = vsyncpa [#allocation4], 0 }
   0x4   :  { %13 = vsyncpa [#allocation4 + $0x1], 0  ;;  %s660_s9 = smov 0   ;;  %s662_s10 = smov 0  }
   0x5   :  { %s664_s11 = smov 0   ;;  %s666_s12 = smov 0  }
   0x6   :  { %s668_s13 = smov 0   ;;  %s670_s14 = smov 0  }
   0x7 LB: > { %s394_s15 = sadd.s32 4294967295, %s636_s14   ;;  %s395_s16 = sadd.s32 4294967294, %s636_s14   ;;  %s636_s14 = sphi %s670_s14, %s19_s14   ;;  %s632_s13 = sphi %s668_s13, %s844_s13   ;;  %s628_s12 = sphi %s666_s12, %s843_s12   ;;  %s624_s11 = sphi %s664_s11, %s842_s11   ;;  %s620_s10 = sphi %s662_s10, %s841_s10   ;;  %s616_s9 = sphi %s660_s9, %s840_s9  }
   0x8   : > { %p74_p0 = scmp.ne.s32.totalorder %s620_s10, %s616_s9  ;;  %p694_p1 = scmp.eq.s32.totalorder %s394_s15, 0 }
   0x9   : > { %p698_p2 = scmp.eq.s32.totalorder %s394_s15, 1  ;;  %p106_p3 = scmp.eq.s32.totalorder %s395_s16, 1 }
   0xa   : > { %p704_p4 = por %p694_p1, %p74_p0  ;;  %p396_p5 = scmp.ge.s32.totalorder %s636_s14, 1 }
   0xb   : > { %p709_p6 = por %p106_p3, %p74_p0  ;;  %p113_p7 = scmp.lt.s32.totalorder %s636_s14, 3 }
   0xc   : > { %s831_s19 = scalar_select %p704_p4, 1, 0 }
   0xd   : > { %s832_s20 = scalar_select %p709_p6, 1, 0 }
   0xe   : > { %p714_p8 = pnand %p396_p5, %p113_p7  ;;  %s638_s22 = smov [#allocation2]  }
   0xf   : > { %s126_s23 = sshll.u32 %s638_s22, 4  ;;  %s31_s25 = sadd.s32 1, %s632_s13  ;;  %s127_s23 = int_to_ptr.vmem [resolvable:$true] %s126_s23 }
  0x10   : > { %p424_p10 = pneg %p714_p8  ;;  %s61_s26 = sadd.s32 1, %s624_s11 }
  0x11   : > { %p33_p12 = scmp.ge.s32.totalorder %s31_s25, 2  ;;  %s509_s27 = scalar_lea.vmem %s127_s23, 64 }
  0x12   : > { %p723_p11 = pnand %p424_p10, %p694_p1  ;;  %p510_p0 = scmp.ne.s32.totalorder %s127_s23, %s509_s27 }
  0x13   : > { %p517_p7 = scmp.lt.s32.totalorder %s127_s23, %s127_s23  ;;  %p518_p6 = scmp.lt.s32.totalorder %s509_s27, %s509_s27 }
  0x14   : > { %p500_p13 = pneg %p723_p11 }
  0x15   : > { %p519_p9 = por %p518_p6, %p517_p7 }
  0x16   : > { %p512_p3 = pnand %p510_p0, %p500_p13 }
  0x18   : > { %p513_p5 = pneg %p512_p3 }
  0x1a   : > { %p520_p4 = pnand %p519_p9, %p513_p5 }
  0x1c   : > { %523 = shalt.err (!%p520_p4)
}
  0x1d   : > { %427 = dma.hbm_to_vmem [thread:$0]  (!%p723_p11), %s825_s0, 64, %s127_s23, [#allocation3]  }
  0x1e   : > { %s846_s25 = smov (%p33_p12, %s31_s25), 0  ;;  %p68_p6 = scmp.ne.s32.totalorder %s624_s11, %s620_s10 }
  0x1f   : > { %p69_p4 = scmp.eq.s32.totalorder %s636_s14, 0  ;;  %s56_s30 = ssub.s32 %s632_s13, %s846_s25 }
  0x20   : > { %p437_p9 = scmp.lt.s32.totalorder %s636_s14, 2  ;;  %p59_p10 = scmp.eq.s32.totalorder %s56_s30, 0 }
  0x21   : > { %p70_p13 = por %p69_p4, %p68_p6  ;;  %p746_p0 = por %p698_p2, %p68_p6 }
  0x22   : > { %s137_s4 = sand.u32 1, %s624_s11   ;;  %s414_s7 = sshll.u32 %s632_s13, 7 }
  0x23   : > { %s752_s5 = scalar_select %p59_p10, %s624_s11, %s61_s26  }
  0x24   : > { %s399_s6 = sshll.u32 %s137_s4, 3  ;;  %s149_s16 = scalar_lea.hbm %s826_s1, %s414_s7 }
  0x25   : > { %s141_s22 = scalar_lea.vmem [#allocation5], %s399_s6  ;;  %p758_p11 = pnand %p437_p9, %p70_p13 }
  0x26   : > { %s151_s23 = sshll.u32 %s141_s22, 4  ;;  %s138_s18 = scalar_lea.sflag [#allocation6], %s137_s4  ;;  %s152_s23 = int_to_ptr.vmem [resolvable:$true] %s151_s23 }
  0x27   : > { %p526_p2 = pneg %p758_p11  ;;  %s537_s27 = scalar_lea.vmem %s152_s23, 128 }
  0x28   : > { %p538_p12 = scmp.ne.s32.totalorder %s152_s23, %s537_s27  ;;  %s639_s26 = smov [#allocation5]  }
  0x29   : > { %s542_s28 = sshll.u32 %s639_s26, 4  ;;  %s543_s28 = int_to_ptr.vmem [resolvable:$false] %s542_s28 }
  0x2a   : > { %p540_p3 = pnand %p538_p12, %p526_p2  ;;  %s544_s29 = scalar_lea.vmem %s543_s28, 256 }
  0x2b   : > { %p545_p7 = scmp.lt.s32.totalorder %s152_s23, %s543_s28  ;;  %p546_p6 = scmp.lt.s32.totalorder %s544_s29, %s537_s27 }
  0x2c   : > { %p541_p5 = pneg %p540_p3 }
  0x2d   : > { %p547_p4 = por %p546_p6, %p545_p7 }
  0x2f   : > { %p548_p10 = pnand %p547_p4, %p541_p5 }
  0x31   : > { %551 = shalt.err (!%p548_p10)
}
  0x32   : > { %431 = dma.hbm_to_vmem [thread:$0]  (!%p758_p11), %s149_s16, 128, %s152_s23, %s138_s18  }
  0x33   : > { %160 = sbr.rel (%p714_p8) target bundleno = 215 (0xd7), region = 28 }
  0x38   : > { %603 = dma.done.wait (%p694_p1), [#allocation3], 64  }
  0x39   : > { %605 = vsyncadd (%p694_p1), [#allocation3], 4294967232  ;;  %s773_s30 = sand.u32 1, %s620_s10   ;;  %p837_p9 = scmp.ne.s32.totalorder %s831_s19, 0 }
  0x3a   : > { %s404_s4 = sshll.u32 %s773_s30, 3  ;;  %s167_s6 = scalar_lea.sflag [#allocation6], %s773_s30 }
  0x3b   : > { %s170_s7 = scalar_lea.vmem [#allocation5], %s404_s4 }
  0x3c   : > { %607 = dma.done.wait (%p837_p9), %s167_s6, 128  }
  0x3d   : > { %609 = vsyncadd (%p837_p9), %s167_s6, 4294967168  ;;  %v640_v0 = vmov 0   ;;  %v641_v1 = vmov 2   ;;  %v193_v2 = vld [vmem:[#allocation2] sm:$0xf]  ;;  %v642_v3 = vmov 1   ;;  %v196_v5 = vlaneseq }
  0x3e   : > { %493 = vset.pattern.permute.xlu0 %v640_v0  ;;  %495 = vset.pattern.permute.xlu1 %v641_v1  ;;  %v643_v4 = vmov 3   ;;  %v194_v9 = vld [vmem:[%s170_s7] ss:$4 sm:$0x3]  ;;  %s415_s17 = sshll.u32 %s628_s12, 7  ;;  %s190_s19 = scalar_lea.vmem [#allocation7], %s404_s4 }
  0x3f   : > { %208 = vperm.xlu0 %493, %v193_v2   ;;  %248 = vperm.xlu1 %495, %v193_v2   ;;  %v197_v6 = vshrl.u32 %v196_v5, 7  ;;  %v406_v10 = vld [vmem:[%s170_s7 + $0x1] ss:$4 sm:$0x3]  ;;  %s298_s21 = sshll.u32 %s190_s19, 4  ;;  %s296_s16 = scalar_lea.hbm %s827_s2, %s415_s17  ;;  %s299_s21 = int_to_ptr.vmem [resolvable:$true] %s298_s21 }
  0x40   : > { %v407_v12 = vld [vmem:[%s170_s7 + $0x2] ss:$4 sm:$0x3]  ;;  %v408_v14 = vld [vmem:[%s170_s7 + $0x3] ss:$4 sm:$0x3] }
  0x41   : > { %v198_v7 = vsub.s32 0, %v197_v6  ;;  %v202_v8 = vsub.s32 1, %v197_v6  ;;  %s282_s22 = scalar_lea.sflag [#allocation4], %s773_s30  ;;  %s552_s23 = scalar_lea.vmem %s299_s21, 128 }
  0x42   : > { %p553_p1 = scmp.ne.s32.totalorder %s299_s21, %s552_s23  ;;  %s644_s24 = smov [#allocation7]  }
  0x43   : > { %494 = vset.pattern.permute.xlu0 %v642_v3  ;;  %496 = vset.pattern.permute.xlu1 %v643_v4  ;;  %v199_v15 = vrot.slane %v194_v9, %v198_v7  ;;  %v203_v16 = vrot.slane %v194_v9, %v202_v8  ;;  %v219_v17 = vrot.slane %v406_v10, %v198_v7  ;;  %s556_s12 = sshll.u32 %s644_s24, 4  ;;  %s557_s12 = int_to_ptr.vmem [resolvable:$false] %s556_s12 }
  0x44   : > { %227 = vperm.xlu0 %494, %v193_v2   ;;  %269 = vperm.xlu1 %496, %v193_v2   ;;  %v223_v18 = vrot.slane %v406_v10, %v202_v8  ;;  %v240_v19 = vrot.slane %v407_v12, %v198_v7  ;;  %v244_v20 = vrot.slane %v407_v12, %v202_v8  ;;  %p554_p8 = pnand %p553_p1, %p746_p0  ;;  %s558_s18 = scalar_lea.vmem %s557_s12, 256 }
  0x45   : > { %v261_v21 = vrot.slane %v408_v14, %v198_v7  ;;  %v265_v22 = vrot.slane %v408_v14, %v202_v8  ;;  %p559_p11 = scmp.lt.s32.totalorder %s299_s21, %s557_s12  ;;  %p560_p2 = scmp.lt.s32.totalorder %s558_s18, %s552_s23 }
  0x46   : > { %p555_p13 = pneg %p554_p8 }
  0x47   : > { %p561_p12 = por %p560_p2, %p559_p11 }
  0x48   : > { %497 = vset.pattern.permute.xlu0 %v643_v4 }
  0x49   : > { %p562_p3 = pnand %p561_p12, %p555_p13 }
  0xba   : > { %v209_v11 = vpop.permute.xlu0 %208  ;;  %v249_v13 = vpop.permute.xlu1 %248 }
  0xbb   : > { %v211_v25 = vmul.f32 %v209_v11, %v199_v15  ;;  %v212_v26 = vmul.f32 %v209_v11, %v203_v16  ;;  %v251_v29 = vmul.f32 %v249_v13, %v240_v19  ;;  %v252_v30 = vmul.f32 %v249_v13, %v244_v20 }
  0xbf   : > { %v228_v23 = vpop.permute.xlu0 %227  ;;  %v270_v24 = vpop.permute.xlu1 %269 }
  0xc0   : > { %v230_v27 = vmul.f32 %v228_v23, %v219_v17  ;;  %v231_v28 = vmul.f32 %v228_v23, %v223_v18  ;;  %v272_v33 = vmul.f32 %v270_v24, %v261_v21  ;;  %v273_v34 = vmul.f32 %v270_v24, %v265_v22 }
  0xc2   : > { %v232_v31 = vadd.f32 %v230_v27, %v211_v25  ;;  %v233_v32 = vadd.f32 %v231_v28, %v212_v26 }
  0xc4   : > { %v253_v35 = vadd.f32 %v251_v29, %v232_v31  ;;  %v254_v36 = vadd.f32 %v252_v30, %v233_v32 }
  0xc6   : > { %v274_v37 = vadd.f32 %v272_v33, %v253_v35  ;;  %v275_v38 = vadd.f32 %v273_v34, %v254_v36 }
  0xc8   : > { %v278_v39 = vcombine.low %v274_v37, %v275_v38 }
  0xca   : > { %280 = vst [vmem:[%s190_s19] sm:$0xff] %v278_v39 }
  0xcb   : > { %565 = shalt.err (!%p562_p3)
}
  0xcc   : > { %s566_s27 = scalar_lea.hbm %s296_s16, 128  ;;  %s570_s29 = scalar_lea.hbm %s827_s2, 256 }
  0xcd   : > { %p567_p5 = scmp.ne.s32.totalorder %s296_s16, %s566_s27  ;;  %p571_p4 = scmp.lt.s32.totalorder %s296_s16, %s827_s2 }
  0xce   : > { %p572_p10 = scmp.lt.s32.totalorder %s570_s29, %s566_s27 }
  0xcf   : > { %p568_p7 = pnand %p567_p5, %p746_p0 }
  0xd0   : > { %p573_p9 = por %p572_p10, %p571_p4 }
  0xd1   : > { %p569_p6 = pneg %p568_p7 }
  0xd3   : > { %p574_p1 = pnand %p573_p9, %p569_p6 }
  0xd5   : > { %577 = shalt.err (!%p574_p1)
}
  0xd6   : > { %422 = dma.vmem_to_hbm [thread:$0]  (%p746_p0), %s299_s21, 128, %s296_s16, %s282_s22  }
  0xd7 PF: > { %s310_s6 = sand.u32 1, %s616_s9   ;;  %p838_p8 = scmp.ne.s32.totalorder %s832_s20, 0 }
  0xd8   : > { %p839_p13 = scmp.ge.s32.totalorder %s636_s14, 2  ;;  %s311_s7 = scalar_lea.sflag [#allocation4], %s310_s6 }
  0xda   : > { %p433_p11 = pnand %p839_p13, %p838_p8 }
  0xdc   : > { %p434_p2 = pneg %p433_p11 }
  0xde   : > { %611 = dma.done.wait (%p434_p2), %s311_s7, 128  }
  0xdf   : > { %613 = vsyncadd (%p434_p2), %s311_s7, 4294967168  ;;  %s19_s14 = sadd.s32 1, %s636_s14   ;;  %s840_s9 = smov %s620_s10 }
  0xe0   : > { %p16_p12 = scmp.ge.s32.totalorder %s19_s14, 4   ;;  %s841_s10 = smov %s624_s11 }
  0xe1   : > { %s842_s11 = smov %s752_s5  ;;  %s843_s12 = smov %s632_s13 }
  0xe2   : > { %s844_s13 = smov %s846_s25  ;;  %18 = sbr.rel (!%p16_p12) target bundleno = 7 (0x7), region = 81 }
  0xe7   :  { %316 = vsyncpa [#allocation3], 1 }
  0xe8   :  { %318 = vsyncpa [#allocation3 + $0x1], 1 }
  0xe9   :  { %319 = vsyncpa [#allocation6], 1 }
  0xea   :  { %321 = vsyncpa [#allocation6 + $0x1], 1 }
  0xeb   :  { %322 = vsyncpa [#allocation4], 1 }
  0xec   :  { %324 = vsyncpa [#allocation4 + $0x1], 1 }

</bundles_post_ra>
